<compile_context>
chip_gen: v7x
topology: tpu7x:2x2x1
jax: 0.10.0
libtpu: 0.0.40
codegen_flags: <defaults>
</compile_context>

<pallas_src>
import jax
import jax.numpy as jnp
from jax.experimental import pallas as pl
from jax.experimental.pallas import tpu as pltpu


_EPS = 1e-3  # nn.BatchNorm2d(nIn, eps=0.001)


def _pick_tile(total, unit, max_tile):
    """Largest multiple of `unit` dividing `total`, capped at `max_tile`.
    Falls back to the full extent when `total` is not a multiple of `unit`
    (a full-dimension block is always legal)."""
    if total % unit != 0:
        return total
    t = min(total, max_tile)
    t -= t % unit
    while total % t != 0:
        t -= unit
    return t


def _make_stats_kernel(total_m, eps):
    inv_total_m = 1.0 / float(total_m)

    def _stats_kernel(x_ref, gamma_ref, beta_ref, scale_ref, shift_ref,
                      mean_acc, m2_acc):
        # x_ref: (1, tc, thw); gamma/beta/scale/shift refs & scratch: (tc, 1).
        ni = pl.program_id(1)
        si = pl.program_id(2)
        num_s = pl.num_programs(2)
        num_r = pl.num_programs(1) * num_s
        r = ni * num_s + si  # reduction-step index within this channel tile

        @pl.when(r == 0)
        def _():
            mean_acc[...] = jnp.zeros_like(mean_acc)
            m2_acc[...] = jnp.zeros_like(m2_acc)

        x = x_ref[0]                                   # (tc, thw)
        tile_n = x.shape[-1]                           # static
        tile_mean = jnp.sum(x, axis=-1, keepdims=True) * (1.0 / float(tile_n))
        d = x - tile_mean
        tile_m2 = jnp.sum(d * d, axis=-1, keepdims=True)

        # Chan's parallel combine: numerically stable single-pass mean / M2.
        count_a = r.astype(jnp.float32) * float(tile_n)     # elements so far
        w_b = float(tile_n) / (count_a + float(tile_n))
        delta = tile_mean - mean_acc[...]
        mean_acc[...] = mean_acc[...] + delta * w_b
        m2_acc[...] = m2_acc[...] + tile_m2 + (delta * delta) * (count_a * w_b)

        @pl.when(r == num_r - 1)
        def _():
            var = m2_acc[...] * inv_total_m              # biased variance
            inv_std = jax.lax.rsqrt(var + eps)
            scale = gamma_ref[...] * inv_std
            scale_ref[...] = scale
            shift_ref[...] = beta_ref[...] - mean_acc[...] * scale

    return _stats_kernel


def _apply_kernel(x_ref, scale_ref, shift_ref, alpha_ref, o_ref):
    # x_ref / o_ref: (1, tc, thw); scale/shift/alpha: (tc, 1).
    x = x_ref[0]
    y = x * scale_ref[...] + shift_ref[...]
    o_ref[0] = jnp.where(y >= 0.0, y, alpha_ref[...] * y).astype(o_ref.dtype)


def bn_prelu(x_nchw, gamma, beta, alpha, *, eps=_EPS):
    """Fused training-mode BatchNorm2d(eps) + per-channel PReLU on NCHW input."""
    n, c, h, w = x_nchw.shape
    hw = h * w

    x3 = x_nchw.reshape(n, c, hw).astype(jnp.float32)   # free reshape, no transpose
    gamma2 = gamma.reshape(c, 1).astype(jnp.float32)
    beta2 = beta.reshape(c, 1).astype(jnp.float32)
    alpha2 = alpha.reshape(c, 1).astype(jnp.float32)

    tc = _pick_tile(c, 8, 64)        # sublane tile (multiple of 8 or full C)
    thw = _pick_tile(hw, 128, 2048)  # lane-dense tile (multiple of 128 or full HW)
    grid = (c // tc, n, hw // thw)   # channel axis first, reductions last

    x_spec = pl.BlockSpec((1, tc, thw), lambda ci, ni, si: (ni, ci, si))
    par_spec = pl.BlockSpec((tc, 1), lambda ci, ni, si: (ci, 0))
    vmem_limit = 32 * 1024 * 1024    # explicit, with headroom; safe on v5e/v6e/v7x

    # Pass 1: per-channel scale/shift from batch statistics (single read of x).
    scale_c1, shift_c1 = pl.pallas_call(
        _make_stats_kernel(n * hw, eps),
        out_shape=(jax.ShapeDtypeStruct((c, 1), jnp.float32),
                   jax.ShapeDtypeStruct((c, 1), jnp.float32)),
        grid_spec=pltpu.PrefetchScalarGridSpec(
            num_scalar_prefetch=0,
            grid=grid,
            in_specs=[x_spec, par_spec, par_spec],
            out_specs=[par_spec, par_spec],
            scratch_shapes=[pltpu.VMEM((tc, 1), jnp.float32),
                            pltpu.VMEM((tc, 1), jnp.float32)],
        ),
        compiler_params=pltpu.CompilerParams(
            dimension_semantics=("parallel", "arbitrary", "arbitrary"),
            vmem_limit_bytes=vmem_limit,
        ),
    )(x3, gamma2, beta2)

    # Pass 2: streaming elementwise scale/shift + PReLU (second read, one write).
    out3 = pl.pallas_call(
        _apply_kernel,
        out_shape=jax.ShapeDtypeStruct((n, c, hw), jnp.float32),
        grid_spec=pltpu.PrefetchScalarGridSpec(
            num_scalar_prefetch=0,
            grid=grid,
            in_specs=[x_spec, par_spec, par_spec, par_spec],
            out_specs=x_spec,
        ),
        compiler_params=pltpu.CompilerParams(
            dimension_semantics=("parallel", "parallel", "arbitrary"),
            vmem_limit_bytes=vmem_limit,
        ),
    )(x3, scale_c1, shift_c1, alpha2)

    return out3.reshape(n, c, h, w)


def _reference(x, gamma, beta, alpha, eps=_EPS):
    # Pure-JAX reference: training-mode BatchNorm2d + PReLU (NCHW).
    mean = jnp.mean(x, axis=(0, 2, 3), keepdims=True)
    var = jnp.mean((x - mean) ** 2, axis=(0, 2, 3), keepdims=True)
    y = (x - mean) / jnp.sqrt(var + eps)
    y = y * gamma[None, :, None, None] + beta[None, :, None, None]
    a = alpha[None, :, None, None]
    return jnp.where(y >= 0.0, y, a * y)


if __name__ == "__main__":
    key = jax.random.PRNGKey(0)
    k_x, k_g, k_b = jax.random.split(key, 3)

    N, C, H, W = 2, 4, 16, 16
    x = jax.random.normal(k_x, (N, C, H, W), dtype=jnp.float32)

    # Deterministic parameters (shapes follow nn.BatchNorm2d(C), nn.PReLU(C)).
    gamma = 1.0 + 0.1 * jax.random.normal(k_g, (C,), dtype=jnp.float32)
    beta = 0.1 * jax.random.normal(k_b, (C,), dtype=jnp.float32)
    alpha = jnp.full((C,), 0.25, dtype=jnp.float32)  # PyTorch PReLU default init

    out = jax.block_until_ready(bn_prelu(x, gamma, beta, alpha))
    ref = _reference(x, gamma, beta, alpha)

    assert out.shape == (N, C, H, W)
    max_err = float(jnp.max(jnp.abs(out - ref)))
    assert jnp.allclose(out, ref, atol=1e-4, rtol=1e-4), max_err

    print("KERNEL_OK")
</pallas_src>

<mosaic_0001>
module attributes {stable_mosaic.version = 11 : i64} {
  func.func @_stats_kernel(%arg0: i32, %arg1: i32, %arg2: i32, %arg3: memref<1x4x256xf32, #tpu.memory_space<vmem>>, %arg4: memref<4x1xf32, #tpu.memory_space<vmem>>, %arg5: memref<4x1xf32, #tpu.memory_space<vmem>>, %arg6: memref<4x1xf32, #tpu.memory_space<vmem>>, %arg7: memref<4x1xf32, #tpu.memory_space<vmem>>, %arg8: memref<4x1xf32, #tpu.memory_space<vmem>>, %arg9: memref<4x1xf32, #tpu.memory_space<vmem>>) attributes {dimension_semantics = [#tpu.dimension_semantics<parallel>, #tpu.dimension_semantics<arbitrary>, #tpu.dimension_semantics<arbitrary>], iteration_bounds = array<i64: 1, 2, 1>, scalar_prefetch = 0 : i64, scratch_operands = 2 : i64, tpu.core_type = #tpu.core_type<tc>, window_params = [{transform_indices = @transform_0, window_bounds = array<i64: 1, 4, 256>}, {transform_indices = @transform_1, window_bounds = array<i64: 4, 1>}, {transform_indices = @transform_2, window_bounds = array<i64: 4, 1>}, {transform_indices = @transform_3, window_bounds = array<i64: 4, 1>}, {transform_indices = @transform_4, window_bounds = array<i64: 4, 1>}]} {
    %c1_i32 = arith.constant 1 : i32
    %0 = arith.muli %arg1, %c1_i32 : i32
    %1 = arith.addi %0, %arg2 : i32
    %c0_i32 = arith.constant 0 : i32
    %2 = arith.cmpi eq, %1, %c0_i32 : i32
    %3 = arith.extui %2 : i1 to i32
    %c0_i32_0 = arith.constant 0 : i32
    %4 = arith.cmpi ne, %3, %c0_i32_0 : i32
    scf.if %4 {
      %cst_20 = arith.constant 0.000000e+00 : f32
      %38 = vector.broadcast %cst_20 : f32 to vector<4x1xf32>
      %c0_21 = arith.constant 0 : index
      %c0_22 = arith.constant 0 : index
      %39 = vector.load %arg8[%c0_21, %c0_22] : memref<4x1xf32, #tpu.memory_space<vmem>>, vector<4x1xf32>
      tpu.vector_store %arg8[%c0_21, %c0_22], %38 {strides = array<i32>} : memref<4x1xf32, #tpu.memory_space<vmem>>, vector<4x1xf32>,
      %cst_23 = arith.constant 0.000000e+00 : f32
      %40 = vector.broadcast %cst_23 : f32 to vector<4x1xf32>
      %c0_24 = arith.constant 0 : index
      %c0_25 = arith.constant 0 : index
      %41 = vector.load %arg9[%c0_24, %c0_25] : memref<4x1xf32, #tpu.memory_space<vmem>>, vector<4x1xf32>
      tpu.vector_store %arg9[%c0_24, %c0_25], %40 {strides = array<i32>} : memref<4x1xf32, #tpu.memory_space<vmem>>, vector<4x1xf32>,
    } else {
    }
    %c0 = arith.constant 0 : index
    %c0_1 = arith.constant 0 : index
    %c0_2 = arith.constant 0 : index
    %5 = vector.load %arg3[%c0, %c0_1, %c0_2] : memref<1x4x256xf32, #tpu.memory_space<vmem>>, vector<1x4x256xf32>
    %6 = vector.shape_cast %5 : vector<1x4x256xf32> to vector<4x256xf32>
    %cst = arith.constant dense<0.000000e+00> : vector<4xf32>
    %7 = vector.multi_reduction <add>, %6, %cst [1] : vector<4x256xf32> to vector<4xf32>
    %8 = vector.shape_cast %7 : vector<4xf32> to vector<4x1xf32>
    %cst_3 = arith.constant 3.906250e-03 : f32
    %9 = vector.broadcast %cst_3 : f32 to vector<4x1xf32>
    %10 = arith.mulf %8, %9 : vector<4x1xf32>
    %11 = vector.broadcast %10 : vector<4x1xf32> to vector<4x256xf32>
    %12 = arith.subf %6, %11 : vector<4x256xf32>
    %13 = arith.mulf %12, %12 : vector<4x256xf32>
    %cst_4 = arith.constant dense<0.000000e+00> : vector<4xf32>
    %14 = vector.multi_reduction <add>, %13, %cst_4 [1] : vector<4x256xf32> to vector<4xf32>
    %15 = vector.shape_cast %14 : vector<4xf32> to vector<4x1xf32>
    %16 = arith.sitofp %1 : i32 to f32
    %cst_5 = arith.constant 2.560000e+02 : f32
    %17 = arith.mulf %16, %cst_5 : f32
    %cst_6 = arith.constant 2.560000e+02 : f32
    %18 = arith.addf %17, %cst_6 : f32
    %cst_7 = arith.constant 2.560000e+02 : f32
    %19 = arith.divf %cst_7, %18 : f32
    %c0_8 = arith.constant 0 : index
    %c0_9 = arith.constant 0 : index
    %20 = vector.load %arg8[%c0_8, %c0_9] : memref<4x1xf32, #tpu.memory_space<vmem>>, vector<4x1xf32>
    %21 = arith.subf %10, %20 : vector<4x1xf32>
    %c0_10 = arith.constant 0 : index
    %c0_11 = arith.constant 0 : index
    %22 = vector.load %arg8[%c0_10, %c0_11] : memref<4x1xf32, #tpu.memory_space<vmem>>, vector<4x1xf32>
    %23 = vector.broadcast %19 : f32 to vector<4x1xf32>
    %24 = arith.mulf %21, %23 : vector<4x1xf32>
    %25 = arith.addf %22, %24 : vector<4x1xf32>
    %c0_12 = arith.constant 0 : index
    %c0_13 = arith.constant 0 : index
    %26 = vector.load %arg8[%c0_12, %c0_13] : memref<4x1xf32, #tpu.memory_space<vmem>>, vector<4x1xf32>
    tpu.vector_store %arg8[%c0_12, %c0_13], %25 {strides = array<i32>} : memref<4x1xf32, #tpu.memory_space<vmem>>, vector<4x1xf32>,
    %c0_14 = arith.constant 0 : index
    %c0_15 = arith.constant 0 : index
    %27 = vector.load %arg9[%c0_14, %c0_15] : memref<4x1xf32, #tpu.memory_space<vmem>>, vector<4x1xf32>
    %28 = arith.addf %27, %15 : vector<4x1xf32>
    %29 = arith.mulf %21, %21 : vector<4x1xf32>
    %30 = arith.mulf %17, %19 : f32
    %31 = vector.broadcast %30 : f32 to vector<4x1xf32>
    %32 = arith.mulf %29, %31 : vector<4x1xf32>
    %33 = arith.addf %28, %32 : vector<4x1xf32>
    %c0_16 = arith.constant 0 : index
    %c0_17 = arith.constant 0 : index
    %34 = vector.load %arg9[%c0_16, %c0_17] : memref<4x1xf32, #tpu.memory_space<vmem>>, vector<4x1xf32>
    tpu.vector_store %arg9[%c0_16, %c0_17], %33 {strides = array<i32>} : memref<4x1xf32, #tpu.memory_space<vmem>>, vector<4x1xf32>,
    %c1_i32_18 = arith.constant 1 : i32
    %35 = arith.cmpi eq, %1, %c1_i32_18 : i32
    %36 = arith.extui %35 : i1 to i32
    %c0_i32_19 = arith.constant 0 : i32
    %37 = arith.cmpi ne, %36, %c0_i32_19 : i32
    scf.if %37 {
      %c0_20 = arith.constant 0 : index
      %c0_21 = arith.constant 0 : index
      %38 = vector.load %arg9[%c0_20, %c0_21] : memref<4x1xf32, #tpu.memory_space<vmem>>, vector<4x1xf32>
      %cst_22 = arith.constant 0.001953125 : f32
      %39 = vector.broadcast %cst_22 : f32 to vector<4x1xf32>
      %40 = arith.mulf %38, %39 : vector<4x1xf32>
      %cst_23 = arith.constant 1.000000e-03 : f32
      %41 = vector.broadcast %cst_23 : f32 to vector<4x1xf32>
      %42 = arith.addf %40, %41 : vector<4x1xf32>
      %43 = math.rsqrt %42 : vector<4x1xf32>
      %c0_24 = arith.constant 0 : index
      %c0_25 = arith.constant 0 : index
      %44 = vector.load %arg4[%c0_24, %c0_25] : memref<4x1xf32, #tpu.memory_space<vmem>>, vector<4x1xf32>
      %45 = arith.mulf %44, %43 : vector<4x1xf32>
      %c0_26 = arith.constant 0 : index
      %c0_27 = arith.constant 0 : index
      %46 = vector.load %arg6[%c0_26, %c0_27] : memref<4x1xf32, #tpu.memory_space<vmem>>, vector<4x1xf32>
      tpu.vector_store %arg6[%c0_26, %c0_27], %45 {strides = array<i32>} : memref<4x1xf32, #tpu.memory_space<vmem>>, vector<4x1xf32>,
      %c0_28 = arith.constant 0 : index
      %c0_29 = arith.constant 0 : index
      %47 = vector.load %arg5[%c0_28, %c0_29] : memref<4x1xf32, #tpu.memory_space<vmem>>, vector<4x1xf32>
      %c0_30 = arith.constant 0 : index
      %c0_31 = arith.constant 0 : index
      %48 = vector.load %arg8[%c0_30, %c0_31] : memref<4x1xf32, #tpu.memory_space<vmem>>, vector<4x1xf32>
      %49 = arith.mulf %48, %45 : vector<4x1xf32>
      %50 = arith.subf %47, %49 : vector<4x1xf32>
      %c0_32 = arith.constant 0 : index
      %c0_33 = arith.constant 0 : index
      %51 = vector.load %arg7[%c0_32, %c0_33] : memref<4x1xf32, #tpu.memory_space<vmem>>, vector<4x1xf32>
      tpu.vector_store %arg7[%c0_32, %c0_33], %50 {strides = array<i32>} : memref<4x1xf32, #tpu.memory_space<vmem>>, vector<4x1xf32>,
    } else {
    }
    return
  }
  func.func @transform_0(%arg0: i32, %arg1: i32, %arg2: i32) -> (i32, i32, i32) {
    %c0_i32 = arith.constant 0 : i32
    return %arg1, %arg0, %arg2 : i32, i32, i32
  }
  func.func @transform_1(%arg0: i32, %arg1: i32, %arg2: i32) -> (i32, i32) {
    %c0_i32 = arith.constant 0 : i32
    %c0_i32_0 = arith.constant 0 : i32
    return %arg0, %c0_i32 : i32, i32
  }
  func.func @transform_2(%arg0: i32, %arg1: i32, %arg2: i32) -> (i32, i32) {
    %c0_i32 = arith.constant 0 : i32
    %c0_i32_0 = arith.constant 0 : i32
    return %arg0, %c0_i32 : i32, i32
  }
  func.func @transform_3(%arg0: i32, %arg1: i32, %arg2: i32) -> (i32, i32) {
    %c0_i32 = arith.constant 0 : i32
    %c0_i32_0 = arith.constant 0 : i32
    return %arg0, %c0_i32 : i32, i32
  }
  func.func @transform_4(%arg0: i32, %arg1: i32, %arg2: i32) -> (i32, i32) {
    %c0_i32 = arith.constant 0 : i32
    %c0_i32_0 = arith.constant 0 : i32
    return %arg0, %c0_i32 : i32, i32
  }
}

</mosaic_0001>

<bundles_post_ra>
// kernel: tpu_custom_call.1
= control target key start
LH: loop header
LB: loop body
LE: loop exit
PB: predicated region body
PF: predicated region fallthrough
CT: control target
= control target key end

     0   :  { %10 = vsyncpa [#allocation5], 0  ;;  %s833_s0 = inlined_call_operand.hbm [shape: f32[2,4,256], index: 0, kind: input, shape index: {}]   ;;  %s834_s1 = inlined_call_operand.vmem [shape: f32[4,1], index: 1, kind: input, shape index: {}]   ;;  %s835_s2 = inlined_call_operand.vmem [shape: f32[4,1], index: 2, kind: input, shape index: {}]   ;;  %s836_s3 = inlined_call_operand.vmem [shape: f32[4,1], index: 3, kind: output, shape index: {0}]   ;;  %s837_s4 = inlined_call_operand.vmem [shape: f32[4,1], index: 4, kind: output, shape index: {1}]  }
   0x1   :  { %12 = vsyncpa [#allocation5 + $0x1], 0  ;;  %s690_s15 = smov 0   ;;  %s692_s16 = smov 0  }
   0x2   :  { %s694_s17 = smov 0   ;;  %s696_s18 = smov 0  }
   0x3   :  { %s698_s19 = smov 0   ;;  %s700_s20 = smov 0  }
   0x4 LB: > { %s499_s21 = sadd.s32 4294967295, %s660_s20   ;;  %s33_s22 = sadd.s32 1, %s656_s19  ;;  %s660_s20 = sphi %s700_s20, %s18_s20   ;;  %s656_s19 = sphi %s698_s19, %s847_s19   ;;  %s652_s18 = sphi %s696_s18, %s846_s18   ;;  %s648_s17 = sphi %s694_s17, %s845_s17   ;;  %s644_s16 = sphi %s692_s16, %s844_s16   ;;  %s640_s15 = sphi %s690_s15, %s843_s15  }
   0x5   : > { %p35_p0 = scmp.ge.s32.totalorder %s33_s22, 2  ;;  %s48_s23 = sadd.s32 1, %s648_s17 }
   0x6   : > { %p55_p1 = scmp.ne.s32.totalorder %s648_s17, %s644_s16  ;;  %p56_p2 = scmp.eq.s32.totalorder %s660_s20, 0 }
   0x7   : > { %s849_s22 = smov (%p35_p0, %s33_s22), 0  ;;  %p61_p4 = scmp.ne.s32.totalorder %s644_s16, %s640_s15 }
   0x8   : > { %p726_p3 = por %p56_p2, %p55_p1  ;;  %s41_s25 = ssub.s32 %s656_s19, %s849_s22 }
   0x9   : > { %p62_p5 = scmp.eq.s32.totalorder %s499_s21, 0  ;;  %p46_p6 = scmp.eq.s32.totalorder %s41_s25, 0 }
   0xa   : > { %p524_p8 = scmp.lt.s32.totalorder %s660_s20, 2  ;;  %s203_s28 = sand.u32 1, %s648_s17  }
   0xb   : > { %p733_p7 = por %p62_p5, %p61_p4  ;;  %s515_s29 = sshll.u32 %s656_s19, 7 }
   0xc   : > { %s739_s27 = scalar_select %p46_p6, %s648_s17, %s48_s23  }
   0xd   : > { %s504_s30 = sshll.u32 %s203_s28, 3  ;;  %s746_s7 = scalar_lea.hbm %s833_s0, %s515_s29 }
   0xe   : > { %s207_s8 = scalar_lea.vmem [#allocation4], %s504_s30  ;;  %p750_p9 = pnand %p524_p8, %p726_p3 }
   0xf   : > { %s219_s9 = sshll.u32 %s207_s8, 4  ;;  %s204_s11 = scalar_lea.sflag [#allocation5], %s203_s28  ;;  %s754_s9 = int_to_ptr.vmem [resolvable:$true] %s219_s9 }
  0x10   : > { %s580_s12 = scalar_lea.hbm %s746_s7, 128  ;;  %p582_p13 = pneg %p750_p9 }
  0x11   : > { %p581_p12 = scmp.ne.s32.totalorder %s746_s7, %s580_s12  ;;  %s585_s15 = scalar_lea.hbm %s833_s0, 256 }
  0x12   : > { %p586_p2 = scmp.lt.u32.totalorder %s746_s7, %s833_s0  ;;  %p587_p3 = scmp.lt.u32.totalorder %s585_s15, %s580_s12 }
  0x13   : > { %p583_p0 = pnand %p582_p13, %p581_p12  ;;  %p589_p5 = scmp.lt.u32.totalorder %s580_s12, %s746_s7 }
  0x14   : > { %p588_p4 = por %p587_p3, %p586_p2 }
  0x15   : > { %p584_p1 = pneg %p583_p0 }
  0x16   : > { %p590_p6 = por %p589_p5, %p588_p4 }
  0x18   : > { %p591_p8 = pnand %p590_p6, %p584_p1 }
  0x1a   : > { %594 = shalt.err (!%p591_p8)
}
  0x1b   : > { %s595_s24 = scalar_lea.vmem %s754_s9, 128  ;;  %s662_s25 = smov [#allocation4]  }
  0x1c   : > { %p596_p12 = scmp.ne.s32.totalorder %s754_s9, %s595_s24  ;;  %s600_s28 = sshll.u32 %s662_s25, 4  ;;  %s601_s28 = int_to_ptr.vmem [resolvable:$false] %s600_s28 }
  0x1d   : > { %s602_s29 = scalar_lea.vmem %s601_s28, 256  ;;  %p603_p11 = scmp.lt.s32.totalorder %s754_s9, %s601_s28 }
  0x1e   : > { %p598_p0 = pnand %p596_p12, %p582_p13  ;;  %p604_p2 = scmp.lt.s32.totalorder %s602_s29, %s595_s24 }
  0x20   : > { %p599_p10 = pneg %p598_p0  ;;  %p605_p3 = por %p604_p2, %p603_p11 }
  0x22   : > { %p606_p4 = pnand %p605_p3, %p599_p10 }
  0x24   : > { %609 = shalt.err (!%p606_p4)
}
  0x25   : > { %523 = dma.hbm_to_vmem [thread:$0]  (!%p750_p9), %s746_s7, 128, %s754_s9, %s204_s11  }
  0x26   : > { %p841_p1 = scmp.lt.s32.totalorder %s660_s20, 3  ;;  %p842_p5 = scmp.ge.s32.totalorder %s660_s20, 1 }
  0x28   : > { %p225_p13 = pnand %p842_p5, %p841_p1 }
  0x29   : > { %s230_s30 = sand.u32 (!%p225_p13), 1, %s644_s16  }
  0x2a   : > { %228 = sbr.rel (%p225_p13) target bundleno = 396 (0x18c), region = 32  ;;  %s508_s5 = sshll.u32 (!%p225_p13), %s230_s30, 3 }
  0x2b   : > { %s231_s6 = scalar_lea.sflag (!%p225_p13), [#allocation5], %s230_s30  ;;  %s234_s8 = scalar_lea.vmem (!%p225_p13), [#allocation4], %s508_s5 }
  0x31   : > { %635 = dma.done.wait (%p733_p7), %s231_s6, 128  }
  0x32   : > { %637 = vsyncadd (%p733_p7), %s231_s6, 4294967168  ;;  %p509_p10 = scmp.ne.s32.totalorder %s652_s18, 0 }
  0x33   : > { %vm292_vm0 = vcmask (!%p509_p10), 3072   ;;  %v663_v0 = vmov (!%p509_p10), 0.0  }
  0x34   : > { %291 = sbr.rel (%p509_p10) target bundleno = 59 (0x3b), region = 40  ;;  %293 = vst.msk [vmem:[#allocation2] sm:$0xf] (!%p509_p10), %vm292_vm0, %v663_v0  ;;  %294 = vst.msk [vmem:[#allocation3] sm:$0xf] (!%p509_p10), %vm292_vm0, %v663_v0 }
  0x3b PF: > { %v295_v1 = vld [vmem:[%s234_s8] sm:$0xff]  ;;  %vm299_vm1 = vcmask 1043456   ;;  %s325_s7 = scvt.s32.f32 %s652_s18  ;;  %v664_v8 = vmov 839922192   ;;  %v310_v10 = vlaneseq  ;;  %v332_v14 = vld [vmem:[#allocation2] sm:$0xf] }
  0x3c   : > { %v297_v2 = vcombine.high %v295_v1, %v295_v1  ;;  %v300_v3 = vsel %vm299_vm1, %v295_v1, 0.0  ;;  %v308_v9 = vunpack.c.l.s4 %v664_v8  ;;  %vm337_vm2 = vcmask 3072   ;;  %v339_v31 = vld [vmem:[#allocation3] sm:$0xf]  ;;  %p510_p7 = scmp.ne.s32.totalorder %s652_s18, 1 }
  0x3d   : > { %s326_s9 = smul.f32 256.0, %s325_s7  ;;  %v311_v12 = vshrl.u32 %v310_v10, 7  ;;  %v355_v38 = vld [vmem:[%s834_s1] sm:$0xf] (!%p510_p7) }
  0x3e   : > { %v301_v4 = vsel %vm299_vm1, %v297_v2, 0.0  ;;  %v309_v11 = vunpack.c.0.s8 %v308_v9  ;;  %v358_v42 = vld [vmem:[%s835_s2] sm:$0xf] (!%p510_p7) }
  0x3f   : > { %v302_v5 = vadd.f32 %v301_v4, %v300_v3  ;;  %s327_s26 = sadd.f32 256.0, %s326_s9 }
  0x40   : > { %v312_v13 = vsub.s32 %v309_v11, %v311_v12 }
  0x41   : > { %303 = vadd.xlane.f32.xlu0 %v302_v5  ;;  %v328_v6 = vstv %s327_s26 }
  0x42   : > { %576 = vrcp.f32 %v328_v6 }
  0x4c   : > { %v577_v7 = vpop.eup %576 }
  0x4d   : > { %516 = vpush %v577_v7 }
  0x7e   : > { %s517_s10 = spop %516 }
  0x7f   : > { %s331_s11 = smul.f32 256.0, %s517_s10 }
  0x81   : > { %s342_s12 = smul.f32 %s331_s11, %s326_s9  ;;  %v334_v17 = vstv %s331_s11 }
  0x83   : > { %v343_v20 = vstv %s342_s12 }
  0xce   : > { %v304_v15 = vpop.xlane.xlu0 %303 }
  0xcf   : > { %v305_v16 = vmul.f32 0.00390625, %v304_v15 }
  0xd1   : > { %v313_v18 = vrot.slane %v305_v16, %v312_v13  ;;  %v333_v19 = vsub.f32 %v305_v16, %v332_v14 }
  0xd3   : > { %v315_v21 = vsub.f32 %v295_v1, %v313_v18  ;;  %v341_v22 = vmul.f32 %v333_v19, %v333_v19  ;;  %v335_v23 = vmul.f32 %v334_v17, %v333_v19 }
  0xd5   : > { %v336_v24 = vadd.f32 %v335_v23, %v332_v14  ;;  %v344_v25 = vmul.f32 %v343_v20, %v341_v22  ;;  %v316_v26 = vmul.f32 %v315_v21, %v315_v21 }
  0xd7   : > { %v318_v27 = vcombine.high %v316_v26, %v316_v26  ;;  %338 = vst.msk [vmem:[#allocation2] sm:$0xf] %vm337_vm2, %v336_v24  ;;  %v320_v28 = vsel %vm299_vm1, %v316_v26, 0.0 }
  0xd9   : > { %v321_v29 = vsel %vm299_vm1, %v318_v27, 0.0 }
  0xda   : > { %v322_v30 = vadd.f32 %v321_v29, %v320_v28 }
  0xdc   : > { %323 = vadd.xlane.f32.xlu0 %v322_v30 }
  0xde   : > { %v359_v40 = vld [vmem:[#allocation2] sm:$0xf] (!%p510_p7) }
 0x168   : > { %350 = sbr.rel (%p510_p7) target bundleno = 396 (0x18c), region = 44 }
 0x169   : > { %v324_v32 = vpop.xlane.xlu0 %323 }
 0x16a   : > { %v340_v33 = vadd.f32 %v339_v31, %v324_v32 }
 0x16c   : > { %v345_v34 = vadd.f32 %v344_v25, %v340_v33 }
 0x16e   : > { %346 = vst.msk [vmem:[#allocation3] sm:$0xf] %vm337_vm2, %v345_v34 }
 0x175   : > { %v351_v35 = vld [vmem:[#allocation3] sm:$0xf] }
 0x176   : > { %v352_v36 = vmul.f32 0.001953125, %v351_v35 }
 0x178   : > { %v353_v37 = vadd.f32 0.001, %v352_v36 }
 0x17a   : > { %578 = vrsqrt.f32 %v353_v37 }
 0x184   : > { %v579_v39 = vpop.eup %578 }
 0x185   : > { %v356_v41 = vmul.f32 %v579_v39, %v355_v38 }
 0x187   : > { %357 = vst.msk [vmem:[%s836_s3] sm:$0xf] %vm337_vm2, %v356_v41  ;;  %v360_v43 = vmul.f32 %v359_v40, %v356_v41 }
 0x189   : > { %v361_v44 = vsub.f32 %v358_v42, %v360_v43 }
 0x18b   : > { %362 = vst.msk [vmem:[%s837_s4] sm:$0xf] %vm337_vm2, %v361_v44 }
 0x18c PF: > { %s18_s20 = sadd.s32 1, %s660_s20   ;;  %s843_s15 = smov %s644_s16 }
 0x18d   : > { %p15_p9 = scmp.ge.s32.totalorder %s18_s20, 4   ;;  %s844_s16 = smov %s648_s17 }
 0x18e   : > { %s845_s17 = smov %s739_s27  ;;  %s846_s18 = smov %s656_s19 }
 0x18f   : > { %s847_s19 = smov %s849_s22  ;;  %17 = sbr.rel (!%p15_p9) target bundleno = 4 (0x4), region = 98 }
 0x196   :  { %396 = vsyncpa [#allocation5], 1 }
 0x197   :  { %398 = vsyncpa [#allocation5 + $0x1], 1 }

</bundles_post_ra>
